<compile_context>
chip_gen: v5e
topology: v5e:2x2
jax: 0.10.0
libtpu: 0.0.40
codegen_flags: <defaults>
</compile_context>

<pallas_src>
import functools
import math

import jax
import jax.numpy as jnp
from jax import lax
from jax.experimental import pallas as pl
from jax.experimental.pallas import tpu as pltpu


MAX_TOKEN_TILE = 256                 # hard cap on tokens gathered per grid step
TOKEN_TILE_TARGET_BYTES = 4 << 20    # ~4 MiB output block per step (v7x-safe)
ONEHOT_MAX_V = 1024                  # one-hot MXU gather only for small vocabs


def _round_up(x, m):
    return ((x + m - 1) // m) * m


def _vmem_capacity_bytes():
    try:
        cap = int(pltpu.get_tpu_info().vmem_capacity_bytes)
        if cap > 0:
            return cap
    except Exception:
        pass
    return 64 << 20  # conservative (v7x-sized) fallback


def _select_path(v, d, itemsize, vmem_cap):
    table_bytes = v * d * itemsize
    # Keep the resident table at most ~1/4 of physical VMEM:
    # ~16 MiB on v7x (64 MiB), ~32 MiB on v5e/v6e (128 MiB).
    table_budget = max(8 << 20, min(vmem_cap // 4, 32 << 20))
    if table_bytes <= table_budget:
        return "onehot" if v <= ONEHOT_MAX_V else "vmem_gather"
    return "hbm_gather"


# ---------------------------------------------------------------------------
# Path 1: table resident in VMEM, gather = one-hot @ table on the MXU.
# ---------------------------------------------------------------------------
def _embed_onehot_kernel(idx_ref, table_ref, out_ref):
    idx = idx_ref[...]                                       # (T, 1) int32
    t, v = idx.shape[0], table_ref.shape[0]
    one_hot = (idx == lax.broadcasted_iota(jnp.int32, (t, v), 1))
    out_ref[...] = jnp.dot(
        one_hot.astype(table_ref.dtype), table_ref[...],
        preferred_element_type=jnp.float32).astype(out_ref.dtype)


# ---------------------------------------------------------------------------
# Path 2: table resident in VMEM, per-row copy inside VMEM (large V).
# ---------------------------------------------------------------------------
def _embed_vmem_gather_kernel(idx_smem, table_ref, out_ref, *, token_tile):
    base = pl.program_id(0) * token_tile

    def gather_one(t, carry):
        row = idx_smem[base + t]                             # cheap SMEM read
        out_ref[pl.ds(t, 1), :] = table_ref[pl.ds(row, 1), :]
        return carry

    lax.fori_loop(0, token_tile, gather_one, 0, unroll=8)


# ---------------------------------------------------------------------------
# Path 3: table stays in HBM; per-row DMA lands directly in the output block.
# ---------------------------------------------------------------------------
def _embed_hbm_gather_kernel(idx_smem, table_hbm, out_ref, sem, *,
                             token_tile, n_tokens):
    base = pl.program_id(0) * token_tile
    nvalid = jnp.minimum(token_tile, n_tokens - base)        # skip padded rows

    # Issue every valid row DMA for this tile (they run concurrently on a
    # single DMA semaphore) ...
    @pl.loop(0, nvalid)
    def _(t):
        row = idx_smem[base + t]
        pltpu.make_async_copy(table_hbm.at[pl.ds(row, 1), :],
                              out_ref.at[pl.ds(t, 1), :], sem).start()

    # ... then drain them. Completions may land out of order, but each wait
    # retires exactly one row's worth of bytes, and the descriptors here are
    # rebuilt with the SAME src/dst slices that were started.
    @pl.loop(0, nvalid)
    def _(t):
        row = idx_smem[base + t]
        pltpu.make_async_copy(table_hbm.at[pl.ds(row, 1), :],
                              out_ref.at[pl.ds(t, 1), :], sem).wait()

    # Give padded rows of a partial last tile a defined value (zero trip count
    # on full tiles); Pallas drops them on the masked partial writeback anyway.
    @pl.loop(nvalid, token_tile)
    def _(t):
        out_ref[pl.ds(t, 1), :] = jnp.zeros((1, out_ref.shape[1]), out_ref.dtype)


def custom_embed(x, table, *, force_path=None):
    """Equivalent of customEmbed.forward: out[...] = table[x[...]]."""
    v, d = table.shape
    lead_shape = x.shape
    n = math.prod(lead_shape) if lead_shape else 1
    itemsize = jnp.dtype(table.dtype).itemsize
    vmem_cap = _vmem_capacity_bytes()

    path = force_path if force_path is not None else _select_path(v, d, itemsize, vmem_cap)

    # Token tile: as big as the VMEM budget allows (multiple of 8), but small
    # enough that there are >= 2 tiles when n permits (megacore on v7x).
    tile_cap = max(8, min(MAX_TOKEN_TILE,
                          (TOKEN_TILE_TARGET_BYTES // max(1, d * itemsize)) // 8 * 8))
    half_n = _round_up((n + 1) // 2, 8)
    token_tile = max(8, min(tile_cap, half_n))

    n_pad = _round_up(n, token_tile)
    num_tiles = n_pad // token_tile

    # Clamp (torch raises on OOB; we refuse to gather OOB -- intentional) and
    # pad only the tiny index vector. Padded tokens read row 0 and their
    # output rows are dropped by the masked partial-tile writeback.
    idx = jnp.clip(x.reshape((n,)).astype(jnp.int32), 0, v - 1)
    idx = jnp.pad(idx, (0, n_pad - n))

    table_bytes = v * d * itemsize
    out_block_bytes = token_tile * d * itemsize
    slack = 4 << 20

    def _params(vmem_need):
        return pltpu.CompilerParams(
            dimension_semantics=("parallel",),   # token tiles split across TCs
            vmem_limit_bytes=int(min(vmem_cap, max(vmem_need, 16 << 20))),
        )

    if path == "onehot":
        idx2d = idx.reshape(n_pad, 1)
        vmem_need = 2 * table_bytes + 2 * out_block_bytes + 2 * token_tile * 4 + slack
        out = pl.pallas_call(
            _embed_onehot_kernel,
            out_shape=jax.ShapeDtypeStruct((n, d), table.dtype),
            grid_spec=pltpu.PrefetchScalarGridSpec(
                num_scalar_prefetch=0,
                grid=(num_tiles,),
                in_specs=[
                    pl.BlockSpec((token_tile, 1), lambda i: (i, 0)),  # indices
                    pl.BlockSpec((v, d), lambda i: (0, 0)),           # resident table
                ],
                out_specs=pl.BlockSpec((token_tile, d), lambda i: (i, 0)),
            ),
            compiler_params=_params(vmem_need),
        )(idx2d, table)

    elif path == "vmem_gather":
        kernel = functools.partial(_embed_vmem_gather_kernel, token_tile=token_tile)
        vmem_need = 2 * table_bytes + 2 * out_block_bytes + slack
        out = pl.pallas_call(
            kernel,
            out_shape=jax.ShapeDtypeStruct((n, d), table.dtype),
            grid_spec=pltpu.PrefetchScalarGridSpec(
                num_scalar_prefetch=1,                       # idx -> SMEM
                grid=(num_tiles,),
                in_specs=[pl.BlockSpec((v, d), lambda i, idx_ref: (0, 0))],
                out_specs=pl.BlockSpec((token_tile, d), lambda i, idx_ref: (i, 0)),
            ),
            compiler_params=_params(vmem_need),
        )(idx, table)

    else:  # "hbm_gather"
        kernel = functools.partial(_embed_hbm_gather_kernel,
                                   token_tile=token_tile, n_tokens=n)
        vmem_need = 2 * out_block_bytes + slack
        out = pl.pallas_call(
            kernel,
            out_shape=jax.ShapeDtypeStruct((n, d), table.dtype),
            grid_spec=pltpu.PrefetchScalarGridSpec(
                num_scalar_prefetch=1,                       # idx -> SMEM
                grid=(num_tiles,),
                in_specs=[pl.BlockSpec(memory_space=pl.ANY)],  # table stays in HBM
                out_specs=pl.BlockSpec((token_tile, d), lambda i, idx_ref: (i, 0)),
                scratch_shapes=[pltpu.SemaphoreType.DMA(())],  # one sem for all rows
            ),
            compiler_params=_params(vmem_need),
        )(idx, table)

    return out.reshape(lead_shape + (d,))


if __name__ == "__main__":
    # customEmbed(sample, dim): nn.Embedding(sample, dim)
    sample = 32   # vocab size V
    dim = 32      # embedding dim D
    batch, seq = 2, 8

    key = jax.random.PRNGKey(0)
    k_table, k_idx = jax.random.split(key)
    table = jax.random.normal(k_table, (sample, dim), dtype=jnp.float32)
    x = jax.random.randint(k_idx, (batch, seq), 0, sample, dtype=jnp.int32)

    ref = jnp.take(table, x, axis=0)   # torch.nn.Embedding forward semantics

    # Main (auto-selected) path: table resident in VMEM, one-hot MXU gather.
    out = jax.block_until_ready(custom_embed(x, table))
    assert out.shape == (batch, seq, dim)
    assert out.dtype == table.dtype
    assert jnp.allclose(out, ref, atol=1e-6), "onehot path mismatch"

    # Exercise the two fallback paths too so they stay correct on-device.
    out_vmem = jax.block_until_ready(custom_embed(x, table, force_path="vmem_gather"))
    assert jnp.allclose(out_vmem, ref, atol=1e-6), "vmem_gather path mismatch"

    out_hbm = jax.block_until_ready(custom_embed(x, table, force_path="hbm_gather"))
    assert jnp.allclose(out_hbm, ref, atol=1e-6), "hbm_gather path mismatch"

    print("KERNEL_OK")
</pallas_src>

<mosaic_0001>
module attributes {stable_mosaic.version = 11 : i64} {
  func.func @_embed_onehot_kernel(%arg0: i32, %arg1: memref<8x1xi32, #tpu.memory_space<vmem>>, %arg2: memref<32x32xf32, #tpu.memory_space<vmem>>, %arg3: memref<8x32xf32, #tpu.memory_space<vmem>>) attributes {dimension_semantics = [#tpu.dimension_semantics<parallel>], iteration_bounds = array<i64: 2>, scalar_prefetch = 0 : i64, scratch_operands = 0 : i64, tpu.core_type = #tpu.core_type<tc>, window_params = [{transform_indices = @transform_0, window_bounds = array<i64: 8, 1>}, {pipeline_mode = #tpu.pipeline_mode<synchronous>, transform_indices = @transform_1, window_bounds = array<i64: 32, 32>}, {transform_indices = @transform_2, window_bounds = array<i64: 8, 32>}]} {
    %c0 = arith.constant 0 : index
    %c0_0 = arith.constant 0 : index
    %0 = vector.load %arg1[%c0, %c0_0] : memref<8x1xi32, #tpu.memory_space<vmem>>, vector<8x1xi32>
    %1 = tpu.iota {dimensions = array<i32: 1>} : vector<8x32xi32>
    %2 = vector.broadcast %0 : vector<8x1xi32> to vector<8x32xi32>
    %3 = arith.cmpi eq, %2, %1 : vector<8x32xi32>
    %4 = arith.extui %3 : vector<8x32xi1> to vector<8x32xi32>
    %5 = arith.sitofp %4 : vector<8x32xi32> to vector<8x32xf32>
    %c0_1 = arith.constant 0 : index
    %c0_2 = arith.constant 0 : index
    %6 = vector.load %arg2[%c0_1, %c0_2] : memref<32x32xf32, #tpu.memory_space<vmem>>, vector<32x32xf32>
    %cst = arith.constant dense<0.000000e+00> : vector<8x32xf32>
    %7 = tpu.matmul %5, %6, %cst {dimension_numbers = #tpu.dot_dimension_numbers<[1], [0], [0], [1], [0, 0, 1, 1], [], []>} : vector<8x32xf32>, vector<32x32xf32>, vector<8x32xf32> -> vector<8x32xf32>
    %c0_3 = arith.constant 0 : index
    %c0_4 = arith.constant 0 : index
    %8 = vector.load %arg3[%c0_3, %c0_4] : memref<8x32xf32, #tpu.memory_space<vmem>>, vector<8x32xf32>
    tpu.vector_store %arg3[%c0_3, %c0_4], %7 {strides = array<i32>} : memref<8x32xf32, #tpu.memory_space<vmem>>, vector<8x32xf32>,
    return
  }
  func.func @transform_0(%arg0: i32) -> (i32, i32) {
    %c0_i32 = arith.constant 0 : i32
    %c0_i32_0 = arith.constant 0 : i32
    return %arg0, %c0_i32 : i32, i32
  }
  func.func @transform_1(%arg0: i32) -> (i32, i32) {
    %c0_i32 = arith.constant 0 : i32
    %c0_i32_0 = arith.constant 0 : i32
    %c0_i32_1 = arith.constant 0 : i32
    return %c0_i32, %c0_i32_0 : i32, i32
  }
  func.func @transform_2(%arg0: i32) -> (i32, i32) {
    %c0_i32 = arith.constant 0 : i32
    %c0_i32_0 = arith.constant 0 : i32
    return %arg0, %c0_i32 : i32, i32
  }
}

</mosaic_0001>

<bundles_post_ra>
// kernel: tpu_custom_call.1
= control target key start
LH: loop header
LB: loop body
LE: loop exit
PB: predicated region body
PF: predicated region fallthrough
CT: control target
= control target key end

     0   :  { %7 = vsyncpa [#allocation3], 0  ;;  %s563_s0 = inlined_call_operand.vmem [shape: s32[16,1], index: 0, kind: input, shape index: {}]   ;;  %s564_s1 = inlined_call_operand.hbm [shape: f32[32,32], index: 1, kind: input, shape index: {}]   ;;  %s565_s2 = inlined_call_operand.hbm [shape: f32[16,32], index: 2, kind: output, shape index: {}]  }
   0x1   :  { %8 = vsyncpa [#allocation4], 0 }
   0x2   :  { %10 = vsyncpa [#allocation4 + $0x1], 0  ;;  %s468_s9 = smov 0   ;;  %s470_s10 = smov 0  }
   0x3   :  { %s472_s11 = smov 0   ;;  %s474_s12 = smov 0  }
   0x4 LB: > { %s489_s13 = sadd.s32 4294967295, %s446_s12   ;;  %s281_s14 = sadd.s32 4294967294, %s446_s12   ;;  %s446_s12 = sphi %s474_s12, %s571_s12   ;;  %s442_s11 = sphi %s472_s11, %s570_s11   ;;  %s438_s10 = sphi %s470_s10, %s569_s10   ;;  %s434_s9 = sphi %s468_s9, %s568_s9  }
   0x5   : > { %s493_s15 = sadd.s32 1, %s446_s12   ;;  %s70_s16 = sadd.s32 1, %s442_s11 }
   0x6   : > { %s67_s17 = ssub.s32 %s446_s12, %s493_s15  ;;  %p80_p0 = scmp.ne.s32.totalorder %s442_s11, %s438_s10 }
   0x7   : > { %p68_p1 = scmp.eq.s32.totalorder %s67_s17, 0  ;;  %p81_p2 = scmp.eq.s32.totalorder %s489_s13, 1 }
   0x8   : > { %p86_p3 = scmp.ne.s32.totalorder %s438_s10, %s434_s9  ;;  %p87_p4 = scmp.eq.s32.totalorder %s281_s14, 1 }
   0x9   : > { %s504_s18 = scalar_select %p68_p1, %s442_s11, %s70_s16  }
   0xa   : > { %p506_p5 = por %p81_p2, %p80_p0  ;;  %p510_p6 = por %p87_p4, %p86_p3 }
   0xb   : > { %p282_p7 = scmp.ge.s32.totalorder %s446_s12, 1  ;;  %p94_p8 = scmp.lt.s32.totalorder %s446_s12, 3 }
   0xc   : > { %p309_p9 = scmp.eq.s32.totalorder %s489_s13, 0  ;;  %s105_s23 = sshll.u32 %s564_s1, 4  ;;  %s106_s23 = int_to_ptr.hbm [resolvable:$true] %s105_s23 }
   0xd   : > { %p95_p10 = pnand %p282_p7, %p94_p8  ;;  %s448_s24 = smov [#allocation2]  }
   0xe   : > { %s107_s25 = sshll.u32 %s448_s24, 4  ;;  %s449_s26 = smov 128   ;;  %s108_s25 = int_to_ptr.vmem [resolvable:$true] %s107_s25 }
   0xf   : > { %p301_p11 = pneg %p95_p10  ;;  %s450_s27 = smov 8  }
  0x10   : > { %130 = sbr.rel (%p95_p10) target bundleno = 275 (0x113), region = 28 }
  0x11   : > { %p302_p12 = pnand %p309_p9, %p301_p11 }
  0x13   : > { %304 = dma.hbm_to_vmem [thread:$0]  (!%p302_p12), %s106_s23, 512, %s108_s25, [#allocation3], %s449_s26, %s449_s26, %s450_s27  }
  0x15   : > { %425 = dma.done.wait (%p309_p9), [#allocation3], 512  }
  0x16   : > { %427 = vsyncadd (%p309_p9), [#allocation3], 4294966784  ;;  %p152_p13 = scmp.lt.s32.totalorder %s489_s13, 1  ;;  %v451_v0 = vmov 0   ;;  %v168_v2 = vld [vmem:[#allocation2 + $0x18] sm:$0xff]  ;;  %v167_v3 = vld [vmem:[#allocation2 + $0x10] sm:$0xff]  ;;  %v157_v6 = vlaneseq }
  0x17   : > { %349 = vset.pattern.permute.xlu0 %v451_v0  ;;  %185 = vmatpush.msra.mxu0 %v168_v2  ;;  %v166_v4 = vld [vmem:[#allocation2 + $0x8] sm:$0xff]  ;;  %v165_v5 = vld [vmem:[#allocation2] sm:$0xff]  ;;  %vm169_vm0 = vcmask 261120   ;;  %v452_v9 = vmov 0.0   ;;  %s149_s5 = sand.u32 1, %s438_s10   ;;  %s292_s7 = sshll.u32 %s489_s13, 3 }
  0x18   : > { %s153_s28 = scalar_select %p152_p13, %s489_s13, 1  ;;  %v158_v7 = vand.u32 127, %v157_v6 }
  0x19   : > { %186 = vmatpush.msra.mxu0 %v167_v3  ;;  %s287_s6 = sshll.u32 %s149_s5, 3  ;;  %s205_s16 = scalar_lea.hbm %s565_s2, %s292_s7 }
  0x1a   : > { %s288_s29 = sshll.u32 %s153_s28, 3  ;;  %s151_s17 = scalar_lea.vmem [#allocation5], %s287_s6 }
  0x1b   : > { %s155_s4 = scalar_lea.vmem %s563_s0, %s288_s29  ;;  %187 = vmatpush.msra.mxu0 %v166_v4  ;;  %s207_s21 = sshll.u32 %s151_s17, 4  ;;  %s208_s21 = int_to_ptr.vmem [resolvable:$true] %s207_s21 }
  0x1c   : > { %v156_v1 = vld [vmem:[%s155_s4] sm:$0xff]  ;;  %s209_s22 = sshll.u32 %s205_s16, 4  ;;  %s195_s23 = scalar_lea.sflag [#allocation4], %s149_s5  ;;  %s210_s22 = int_to_ptr.hbm [resolvable:$true] %s209_s22 }
  0x1d   : > { %160 = vperm.xlu0 %349, %v156_v1   ;;  %188 = vmatpush.msra.mxu0 %v165_v5  ;;  %s394_s24 = sshra.s32 %s210_s22, 4  ;;  %s400_s27 = scalar_lea.hbm %s565_s2, 16  ;;  %s395_s24 = int_to_ptr.hbm [resolvable:$true] %s394_s24 }
  0x1e   : > { %s396_s25 = scalar_lea.hbm %s395_s24, 8  ;;  %p401_p3 = scmp.lt.s32.totalorder %s395_s24, %s565_s2 }
  0x1f   : > { %p397_p0 = scmp.ne.s32.totalorder %s395_s24, %s396_s25  ;;  %p402_p4 = scmp.lt.s32.totalorder %s400_s27, %s396_s25 }
  0x21   : > { %p398_p1 = pnand %p397_p0, %p506_p5  ;;  %p403_p7 = por %p402_p4, %p401_p3 }
  0x23   : > { %p399_p2 = pneg %p398_p1 }
  0x25   : > { %p404_p8 = pnand %p403_p7, %p399_p2 }
  0x8f   : > { %v161_v8 = vpop.permute.xlu0 %160 }
  0x90   : > { %vm162_vm1 = vcmp.eq.s32.totalorder %v161_v8, %v158_v7 }
  0x91   : > { %v289_v10 = vsel %vm162_vm1, 1.0, %v452_v9 }
  0x92   : > { %290 = vmatmul.msk.f32.vlgmr.msra.gmra.mxu0 %vm169_vm0, %v289_v10 }
 0x10f   : > { %v190_v11 = vpop.f32.mrf.mxu0 }
 0x110   : > { %193 = vst.msk [vmem:[%s151_s17] sm:$0xff] %vm169_vm0, %v190_v11 }
 0x111   : > { %407 = shalt.err (!%p404_p8)
}
 0x112   : > { %299 = dma.vmem_to_hbm [thread:$0]  (%p506_p5), %s208_s21, 128, %s210_s22, %s195_s23  }
 0x113 PF: > { %p311_p9 = scmp.ge.s32.totalorder %s446_s12, 2  ;;  %s221_s30 = sand.u32 1, %s434_s9  }
 0x114   : > { %s222_s3 = scalar_lea.sflag [#allocation4], %s221_s30 }
 0x115   : > { %p306_p10 = pnand %p311_p9, %p510_p6 }
 0x117   : > { %p307_p11 = pneg %p306_p10 }
 0x119   : > { %429 = dma.done.wait (%p307_p11), %s222_s3, 128  }
 0x11a   : > { %431 = vsyncadd (%p307_p11), %s222_s3, 4294967168  ;;  %p13_p12 = scmp.ge.s32.totalorder %s493_s15, 4   ;;  %s568_s9 = smov %s438_s10 }
 0x11b   : > { %s569_s10 = smov %s442_s11  ;;  %s570_s11 = smov %s504_s18 }
 0x11c   : > { %s571_s12 = smov %s493_s15  ;;  %15 = sbr.rel (!%p13_p12) target bundleno = 4 (0x4), region = 68 }
 0x121   :  { %228 = vsyncpa [#allocation3], 1 }
 0x122   :  { %230 = vsyncpa [#allocation3 + $0x1], 1 }
 0x123   :  { %231 = vsyncpa [#allocation4], 1 }
 0x124   :  { %233 = vsyncpa [#allocation4 + $0x1], 1 }

</bundles_post_ra>
